<compile_context>
chip_gen: v5e
topology: v5e:2x2
jax: 0.10.0
libtpu: 0.0.40
codegen_flags: <defaults>
</compile_context>

<pallas_src>
import jax
import jax.numpy as jnp
from jax.experimental import pallas as pl
from jax.experimental.pallas import tpu as pltpu

LANE = 128
MIB = 1024 * 1024


def _round_up(n: int, m: int) -> int:
    return ((n + m - 1) // m) * m


def _pad_to(a, shape):
    pads = [(0, t - s) for s, t in zip(a.shape, shape)]
    return jnp.pad(a, pads)


# --------------------------------------------------------------------------
# Kernel
# --------------------------------------------------------------------------
def mlp_kernel(x_ref, w1_ref, b1_ref, w2_ref, b2_ref,
               w3_ref, b3_ref, w4_ref, b4_ref, o_ref):
    # x arrives f32; cast to bf16 in-kernel (VPU has huge slack here).
    x = x_ref[...].astype(jnp.bfloat16)
    # Layer 1: Linear + ReLU  (bf16 operands -> MXU, f32 accumulate)
    h = jnp.dot(x, w1_ref[...], preferred_element_type=jnp.float32)
    h = jnp.maximum(h + b1_ref[...], 0.0)          # elementwise in f32 (v5e-safe)
    # Layer 2: Linear + ReLU
    h = jnp.dot(h.astype(jnp.bfloat16), w2_ref[...],
                preferred_element_type=jnp.float32)
    h = jnp.maximum(h + b2_ref[...], 0.0)
    # Layer 3: Linear + ReLU
    h = jnp.dot(h.astype(jnp.bfloat16), w3_ref[...],
                preferred_element_type=jnp.float32)
    h = jnp.maximum(h + b3_ref[...], 0.0)
    # Layer 4: Linear (no activation); output is narrow (out_size cols, f32).
    out = jnp.dot(h.astype(jnp.bfloat16), w4_ref[...],
                  preferred_element_type=jnp.float32)
    o_ref[...] = (out + b4_ref[...]).astype(o_ref.dtype)


# --------------------------------------------------------------------------
# Param preparation (done ONCE, hoisted out of the per-call path)
# --------------------------------------------------------------------------
def prepare_params(params):
    """Pad hidden dims to multiples of 128 and cast weights to bf16, once."""
    (w1, b1), (w2, b2), (w3, b3), (w4, b4) = params
    in_size = w1.shape[0]
    h1, h2, h3 = w1.shape[1], w2.shape[1], w3.shape[1]
    out_size = w4.shape[1]
    h1p, h2p, h3p = (_round_up(d, LANE) for d in (h1, h2, h3))

    w1p = _pad_to(w1, (in_size, h1p)).astype(jnp.bfloat16)
    w2p = _pad_to(w2, (h1p, h2p)).astype(jnp.bfloat16)
    w3p = _pad_to(w3, (h2p, h3p)).astype(jnp.bfloat16)
    # Only the contraction dim of w4 needs padding; output stays narrow.
    w4p = _pad_to(w4, (h3p, out_size)).astype(jnp.bfloat16)
    # biases stay f32 (added on the f32 elementwise path)
    b1p = _pad_to(b1, (1, h1p))
    b2p = _pad_to(b2, (1, h2p))
    b3p = _pad_to(b3, (1, h3p))
    b4p = b4
    return (w1p, b1p, w2p, b2p, w3p, b3p, w4p, b4p)


# --------------------------------------------------------------------------
# Hardware-aware tile selection
# --------------------------------------------------------------------------
def _tpu_vmem_capacity():
    try:
        return int(pltpu.get_tpu_info().vmem_capacity_bytes)
    except Exception:
        return 128 * MIB  # v5e/v6e default


def _num_tensorcores():
    # Only v7x has 2 TensorCores per chip; detection is best-effort.
    try:
        kind = (getattr(jax.devices()[0], "device_kind", "") or "").lower()
        if "v7" in kind or "7x" in kind:
            return 2
    except Exception:
        pass
    return 1


def _select_bm(B, block_m, vmem_cap):
    # bf16 packs 16 rows per vreg -> round to 16 when possible.
    align = 16 if B >= 16 else 8
    bm = min(block_m, _round_up(B, align))
    bm = max(align, (bm // align) * align)
    # Per-generation cap: v7x has 64 MiB physical VMEM (vs 128 on v5e/v6e).
    max_bm = 4096 if vmem_cap >= 100 * MIB else 2048
    bm = min(bm, max_bm)
    # Split into >=2 grid steps only where the grid actually shards (v7x).
    if _num_tensorcores() >= 2 and pl.cdiv(B, bm) < 2 and bm >= 2 * align:
        bm = max(align, _round_up(bm // 2, align))
    return bm


# --------------------------------------------------------------------------
# Forward
# --------------------------------------------------------------------------
def mlp_forward(x, prepared_params, *, block_m=1024):
    """Fused MLP forward. x: (B, input_size) f32. Returns (B, out_size) f32."""
    w1p, b1p, w2p, b2p, w3p, b3p, w4p, b4p = prepared_params
    B, in_size = x.shape
    assert in_size == w1p.shape[0]
    h1p, h2p, h3p = w1p.shape[1], w2p.shape[1], w3p.shape[1]
    out_size = w4p.shape[1]

    vmem_cap = _tpu_vmem_capacity()
    bm = _select_bm(B, block_m, vmem_cap)
    grid = (pl.cdiv(B, bm),)   # partial last block handled by Pallas masking

    def resident(arr):  # whole-array block, same block every grid step
        return pl.BlockSpec(arr.shape, lambda i: (0, 0))

    weight_bytes = sum(int(a.size) * a.dtype.itemsize for a in prepared_params)
    flops = 2 * B * (in_size * h1p + h1p * h2p + h2p * h3p + h3p * out_size)
    bytes_accessed = B * in_size * 4 + B * out_size * 4 + weight_bytes

    # VMEM footprint estimate: double-buffered x/out blocks + weights +
    # f32 intermediates / bf16 copies; keep generous headroom.
    est_vmem = (2 * bm * in_size * 4
                + 2 * bm * out_size * 4
                + 2 * weight_bytes
                + 6 * bm * LANE * 4)
    vmem_limit = int(min(vmem_cap * 3 // 4, max(32 * MIB, 2 * est_vmem)))

    return pl.pallas_call(
        mlp_kernel,
        out_shape=jax.ShapeDtypeStruct((B, out_size), jnp.float32),
        grid_spec=pl.GridSpec(
            grid=grid,
            in_specs=[
                pl.BlockSpec((bm, in_size), lambda i: (i, 0)),
                resident(w1p), resident(b1p),
                resident(w2p), resident(b2p),
                resident(w3p), resident(b3p),
                resident(w4p), resident(b4p),
            ],
            out_specs=pl.BlockSpec((bm, out_size), lambda i: (i, 0)),
        ),
        compiler_params=pltpu.CompilerParams(
            dimension_semantics=("parallel",),
            vmem_limit_bytes=vmem_limit),
        cost_estimate=pl.CostEstimate(
            flops=flops, transcendentals=0, bytes_accessed=bytes_accessed),
    )(x, w1p, b1p, w2p, b2p, w3p, b3p, w4p, b4p)


# --------------------------------------------------------------------------
# Init + references
# --------------------------------------------------------------------------
def init_params(key, input_size, hidden_size, hidden_size_2, hidden_size_3,
                output_size, dtype=jnp.float32):
    """Deterministic synthetic init; weights stored as (in, out)."""
    dims = [(input_size, hidden_size),
            (hidden_size, hidden_size_2),
            (hidden_size_2, hidden_size_3),
            (hidden_size_3, output_size)]
    params = []
    for (fan_in, fan_out) in dims:
        key, kw, kb = jax.random.split(key, 3)
        bound = 1.0 / jnp.sqrt(fan_in)  # matches PyTorch Linear default scale
        w = jax.random.uniform(kw, (fan_in, fan_out), dtype, -bound, bound)
        b = jax.random.uniform(kb, (1, fan_out), dtype, -bound, bound)
        params.append((w, b))
    return params


def mlp_reference_f32(x, params):
    (w1, b1), (w2, b2), (w3, b3), (w4, b4) = params
    h = jnp.maximum(x @ w1 + b1, 0.0)
    h = jnp.maximum(h @ w2 + b2, 0.0)
    h = jnp.maximum(h @ w3 + b3, 0.0)
    return h @ w4 + b4


def mlp_reference_bf16(x, params):
    """Matches kernel numerics: bf16 matmul operands, f32 accumulation."""
    bf = jnp.bfloat16
    (w1, b1), (w2, b2), (w3, b3), (w4, b4) = params
    h = jnp.dot(x.astype(bf), w1.astype(bf), preferred_element_type=jnp.float32)
    h = jnp.maximum(h + b1, 0.0)
    h = jnp.dot(h.astype(bf), w2.astype(bf), preferred_element_type=jnp.float32)
    h = jnp.maximum(h + b2, 0.0)
    h = jnp.dot(h.astype(bf), w3.astype(bf), preferred_element_type=jnp.float32)
    h = jnp.maximum(h + b3, 0.0)
    return jnp.dot(h.astype(bf), w4.astype(bf),
                   preferred_element_type=jnp.float32) + b4


if __name__ == "__main__":
    # Small shapes consistent with the module defaults
    input_size = 32
    hidden_size = 64
    hidden_size_2 = 90
    hidden_size_3 = 30
    output_size = 16

    key = jax.random.PRNGKey(0)
    key, kp = jax.random.split(key)
    params = init_params(kp, input_size, hidden_size, hidden_size_2,
                         hidden_size_3, output_size)
    prepared = prepare_params(params)          # pad + bf16-cast exactly once
    prepared = jax.block_until_ready(prepared)

    # Exercise: aligned batch, batches requiring a masked partial block,
    # and a multi-step grid with a partial last block (block_m override).
    for batch, bm in ((8, 1024), (10, 1024), (24, 1024), (40, 16)):
        key, kx = jax.random.split(key)
        x = jax.random.normal(kx, (batch, input_size), dtype=jnp.float32)

        out = mlp_forward(x, prepared, block_m=bm)
        out = jax.block_until_ready(out)
        assert out.shape == (batch, output_size)

        ref_bf16 = mlp_reference_bf16(x, params)
        ref_f32 = mlp_reference_f32(x, params)
        # tight vs numerics-matched reference, loose vs pure-f32 reference
        assert jnp.allclose(out, ref_bf16, atol=1e-2, rtol=1e-2), \
            f"mismatch vs bf16 reference at batch={batch}"
        assert jnp.allclose(out, ref_f32, atol=5e-2, rtol=5e-2), \
            f"mismatch vs f32 reference at batch={batch}"

    print("KERNEL_OK")
</pallas_src>

<mosaic_0001>
module attributes {stable_mosaic.version = 11 : i64} {
  func.func @mlp_kernel(%arg0: i32, %arg1: memref<8x32xf32, #tpu.memory_space<vmem>>, %arg2: memref<32x128xbf16, #tpu.memory_space<vmem>>, %arg3: memref<1x128xf32, #tpu.memory_space<vmem>>, %arg4: memref<128x128xbf16, #tpu.memory_space<vmem>>, %arg5: memref<1x128xf32, #tpu.memory_space<vmem>>, %arg6: memref<128x128xbf16, #tpu.memory_space<vmem>>, %arg7: memref<1x128xf32, #tpu.memory_space<vmem>>, %arg8: memref<128x16xbf16, #tpu.memory_space<vmem>>, %arg9: memref<1x16xf32, #tpu.memory_space<vmem>>, %arg10: memref<8x16xf32, #tpu.memory_space<vmem>>) attributes {dimension_semantics = [#tpu.dimension_semantics<parallel>], iteration_bounds = array<i64: 1>, scalar_prefetch = 0 : i64, scratch_operands = 0 : i64, tpu.core_type = #tpu.core_type<tc>, window_params = [{transform_indices = @transform_0, window_bounds = array<i64: 8, 32>}, {pipeline_mode = #tpu.pipeline_mode<synchronous>, transform_indices = @transform_1, window_bounds = array<i64: 32, 128>}, {pipeline_mode = #tpu.pipeline_mode<synchronous>, transform_indices = @transform_2, window_bounds = array<i64: 1, 128>}, {pipeline_mode = #tpu.pipeline_mode<synchronous>, transform_indices = @transform_3, window_bounds = array<i64: 128, 128>}, {pipeline_mode = #tpu.pipeline_mode<synchronous>, transform_indices = @transform_4, window_bounds = array<i64: 1, 128>}, {pipeline_mode = #tpu.pipeline_mode<synchronous>, transform_indices = @transform_5, window_bounds = array<i64: 128, 128>}, {pipeline_mode = #tpu.pipeline_mode<synchronous>, transform_indices = @transform_6, window_bounds = array<i64: 1, 128>}, {pipeline_mode = #tpu.pipeline_mode<synchronous>, transform_indices = @transform_7, window_bounds = array<i64: 128, 16>}, {pipeline_mode = #tpu.pipeline_mode<synchronous>, transform_indices = @transform_8, window_bounds = array<i64: 1, 16>}, {transform_indices = @transform_9, window_bounds = array<i64: 8, 16>}]} {
    %c0 = arith.constant 0 : index
    %c0_0 = arith.constant 0 : index
    %0 = vector.load %arg1[%c0, %c0_0] : memref<8x32xf32, #tpu.memory_space<vmem>>, vector<8x32xf32>
    %1 = arith.truncf %0 : vector<8x32xf32> to vector<8x32xbf16>
    %c0_1 = arith.constant 0 : index
    %c0_2 = arith.constant 0 : index
    %2 = vector.load %arg2[%c0_1, %c0_2] : memref<32x128xbf16, #tpu.memory_space<vmem>>, vector<32x128xbf16>
    %cst = arith.constant dense<0.000000e+00> : vector<8x128xf32>
    %3 = tpu.matmul %1, %2, %cst {dimension_numbers = #tpu.dot_dimension_numbers<[1], [0], [0], [1], [0, 0, 1, 1], [], []>} : vector<8x32xbf16>, vector<32x128xbf16>, vector<8x128xf32> -> vector<8x128xf32>
    %c0_3 = arith.constant 0 : index
    %c0_4 = arith.constant 0 : index
    %4 = vector.load %arg3[%c0_3, %c0_4] : memref<1x128xf32, #tpu.memory_space<vmem>>, vector<1x128xf32>
    %5 = vector.broadcast %4 : vector<1x128xf32> to vector<8x128xf32>
    %6 = arith.addf %3, %5 : vector<8x128xf32>
    %cst_5 = arith.constant 0.000000e+00 : f32
    %7 = vector.broadcast %cst_5 : f32 to vector<8x128xf32>
    %8 = arith.maximumf %6, %7 : vector<8x128xf32>
    %9 = arith.truncf %8 : vector<8x128xf32> to vector<8x128xbf16>
    %c0_6 = arith.constant 0 : index
    %c0_7 = arith.constant 0 : index
    %10 = vector.load %arg4[%c0_6, %c0_7] : memref<128x128xbf16, #tpu.memory_space<vmem>>, vector<128x128xbf16>
    %cst_8 = arith.constant dense<0.000000e+00> : vector<8x128xf32>
    %11 = tpu.matmul %9, %10, %cst_8 {dimension_numbers = #tpu.dot_dimension_numbers<[1], [0], [0], [1], [0, 0, 1, 1], [], []>} : vector<8x128xbf16>, vector<128x128xbf16>, vector<8x128xf32> -> vector<8x128xf32>
    %c0_9 = arith.constant 0 : index
    %c0_10 = arith.constant 0 : index
    %12 = vector.load %arg5[%c0_9, %c0_10] : memref<1x128xf32, #tpu.memory_space<vmem>>, vector<1x128xf32>
    %13 = vector.broadcast %12 : vector<1x128xf32> to vector<8x128xf32>
    %14 = arith.addf %11, %13 : vector<8x128xf32>
    %cst_11 = arith.constant 0.000000e+00 : f32
    %15 = vector.broadcast %cst_11 : f32 to vector<8x128xf32>
    %16 = arith.maximumf %14, %15 : vector<8x128xf32>
    %17 = arith.truncf %16 : vector<8x128xf32> to vector<8x128xbf16>
    %c0_12 = arith.constant 0 : index
    %c0_13 = arith.constant 0 : index
    %18 = vector.load %arg6[%c0_12, %c0_13] : memref<128x128xbf16, #tpu.memory_space<vmem>>, vector<128x128xbf16>
    %cst_14 = arith.constant dense<0.000000e+00> : vector<8x128xf32>
    %19 = tpu.matmul %17, %18, %cst_14 {dimension_numbers = #tpu.dot_dimension_numbers<[1], [0], [0], [1], [0, 0, 1, 1], [], []>} : vector<8x128xbf16>, vector<128x128xbf16>, vector<8x128xf32> -> vector<8x128xf32>
    %c0_15 = arith.constant 0 : index
    %c0_16 = arith.constant 0 : index
    %20 = vector.load %arg7[%c0_15, %c0_16] : memref<1x128xf32, #tpu.memory_space<vmem>>, vector<1x128xf32>
    %21 = vector.broadcast %20 : vector<1x128xf32> to vector<8x128xf32>
    %22 = arith.addf %19, %21 : vector<8x128xf32>
    %cst_17 = arith.constant 0.000000e+00 : f32
    %23 = vector.broadcast %cst_17 : f32 to vector<8x128xf32>
    %24 = arith.maximumf %22, %23 : vector<8x128xf32>
    %25 = arith.truncf %24 : vector<8x128xf32> to vector<8x128xbf16>
    %c0_18 = arith.constant 0 : index
    %c0_19 = arith.constant 0 : index
    %26 = vector.load %arg8[%c0_18, %c0_19] : memref<128x16xbf16, #tpu.memory_space<vmem>>, vector<128x16xbf16>
    %cst_20 = arith.constant dense<0.000000e+00> : vector<8x16xf32>
    %27 = tpu.matmul %25, %26, %cst_20 {dimension_numbers = #tpu.dot_dimension_numbers<[1], [0], [0], [1], [0, 0, 1, 1], [], []>} : vector<8x128xbf16>, vector<128x16xbf16>, vector<8x16xf32> -> vector<8x16xf32>
    %c0_21 = arith.constant 0 : index
    %c0_22 = arith.constant 0 : index
    %28 = vector.load %arg9[%c0_21, %c0_22] : memref<1x16xf32, #tpu.memory_space<vmem>>, vector<1x16xf32>
    %29 = vector.broadcast %28 : vector<1x16xf32> to vector<8x16xf32>
    %30 = arith.addf %27, %29 : vector<8x16xf32>
    %c0_23 = arith.constant 0 : index
    %c0_24 = arith.constant 0 : index
    %31 = vector.load %arg10[%c0_23, %c0_24] : memref<8x16xf32, #tpu.memory_space<vmem>>, vector<8x16xf32>
    tpu.vector_store %arg10[%c0_23, %c0_24], %30 {strides = array<i32>} : memref<8x16xf32, #tpu.memory_space<vmem>>, vector<8x16xf32>,
    return
  }
  func.func @transform_0(%arg0: i32) -> (i32, i32) {
    %c0_i32 = arith.constant 0 : i32
    %c0_i32_0 = arith.constant 0 : i32
    return %arg0, %c0_i32 : i32, i32
  }
  func.func @transform_1(%arg0: i32) -> (i32, i32) {
    %c0_i32 = arith.constant 0 : i32
    %c0_i32_0 = arith.constant 0 : i32
    %c0_i32_1 = arith.constant 0 : i32
    return %c0_i32, %c0_i32_0 : i32, i32
  }
  func.func @transform_2(%arg0: i32) -> (i32, i32) {
    %c0_i32 = arith.constant 0 : i32
    %c0_i32_0 = arith.constant 0 : i32
    %c0_i32_1 = arith.constant 0 : i32
    return %c0_i32, %c0_i32_0 : i32, i32
  }
  func.func @transform_3(%arg0: i32) -> (i32, i32) {
    %c0_i32 = arith.constant 0 : i32
    %c0_i32_0 = arith.constant 0 : i32
    %c0_i32_1 = arith.constant 0 : i32
    return %c0_i32, %c0_i32_0 : i32, i32
  }
  func.func @transform_4(%arg0: i32) -> (i32, i32) {
    %c0_i32 = arith.constant 0 : i32
    %c0_i32_0 = arith.constant 0 : i32
    %c0_i32_1 = arith.constant 0 : i32
    return %c0_i32, %c0_i32_0 : i32, i32
  }
  func.func @transform_5(%arg0: i32) -> (i32, i32) {
    %c0_i32 = arith.constant 0 : i32
    %c0_i32_0 = arith.constant 0 : i32
    %c0_i32_1 = arith.constant 0 : i32
    return %c0_i32, %c0_i32_0 : i32, i32
  }
  func.func @transform_6(%arg0: i32) -> (i32, i32) {
    %c0_i32 = arith.constant 0 : i32
    %c0_i32_0 = arith.constant 0 : i32
    %c0_i32_1 = arith.constant 0 : i32
    return %c0_i32, %c0_i32_0 : i32, i32
  }
  func.func @transform_7(%arg0: i32) -> (i32, i32) {
    %c0_i32 = arith.constant 0 : i32
    %c0_i32_0 = arith.constant 0 : i32
    %c0_i32_1 = arith.constant 0 : i32
    return %c0_i32, %c0_i32_0 : i32, i32
  }
  func.func @transform_8(%arg0: i32) -> (i32, i32) {
    %c0_i32 = arith.constant 0 : i32
    %c0_i32_0 = arith.constant 0 : i32
    %c0_i32_1 = arith.constant 0 : i32
    return %c0_i32, %c0_i32_0 : i32, i32
  }
  func.func @transform_9(%arg0: i32) -> (i32, i32) {
    %c0_i32 = arith.constant 0 : i32
    %c0_i32_0 = arith.constant 0 : i32
    return %arg0, %c0_i32 : i32, i32
  }
}

</mosaic_0001>

<bundles_post_ra>
// kernel: tpu_custom_call.1
= control target key start
LH: loop header
LB: loop body
LE: loop exit
PB: predicated region body
PF: predicated region fallthrough
CT: control target
= control target key end

     0   :  { %14 = vsyncpa [#allocation3], 0  ;;  %s719_s0 = inlined_call_operand.vmem [shape: f32[8,32], index: 0, kind: input, shape index: {}]   ;;  %s720_s1 = inlined_call_operand.hbm [shape: bf16[32,128], index: 1, kind: input, shape index: {}]   ;;  %s721_s2 = inlined_call_operand.vmem [shape: f32[1,128], index: 2, kind: input, shape index: {}]   ;;  %s722_s3 = inlined_call_operand.vmem [shape: bf16[128,128], index: 3, kind: input, shape index: {}]   ;;  %s723_s4 = inlined_call_operand.vmem [shape: f32[1,128], index: 4, kind: input, shape index: {}]   ;;  %s724_s5 = inlined_call_operand.hbm [shape: bf16[128,128], index: 5, kind: input, shape index: {}]   ;;  %s725_s6 = inlined_call_operand.vmem [shape: f32[1,128], index: 6, kind: input, shape index: {}]   ;;  %s726_s7 = inlined_call_operand.vmem [shape: bf16[128,16], index: 7, kind: input, shape index: {}]   ;;  %s727_s8 = inlined_call_operand.vmem [shape: f32[1,16], index: 8, kind: input, shape index: {}]   ;;  %s728_s9 = inlined_call_operand.hbm [shape: f32[8,16], index: 9, kind: output, shape index: {}]  }
   0x1   :  { %15 = vsyncpa [#allocation6], 0 }
   0x2   :  { %16 = vsyncpa [#allocation4], 0  ;;  %s23_s11 = sshll.u32 %s720_s1, 4  ;;  %s592_s12 = smov [#allocation2]   ;;  %s24_s11 = int_to_ptr.hbm [resolvable:$true] %s23_s11 }
   0x3   :  { %s25_s13 = sshll.u32 %s592_s12, 4  ;;  %s42_s16 = sshll.u32 %s724_s5, 4  ;;  %s26_s13 = int_to_ptr.vmem [resolvable:$true] %s25_s13  ;;  %s43_s16 = int_to_ptr.hbm [resolvable:$true] %s42_s16 }
   0x4   :  { %s593_s17 = smov 64   ;;  %s594_s18 = smov 4  }
   0x5   :  { %31 = dma.hbm_to_vmem [thread:$0]  %s24_s11, 256, %s26_s13, [#allocation3], %s593_s17, %s593_s17, %s594_s18  }
   0x6   :  { %s595_s19 = smov [#allocation5]  }
   0x7   :  { %s44_s20 = sshll.u32 %s595_s19, 4  ;;  %s45_s20 = int_to_ptr.vmem [resolvable:$true] %s44_s20 }
   0x8   :  { %50 = dma.hbm_to_vmem [thread:$0]  %s43_s16, 1024, %s45_s20, [#allocation6], %s593_s17, %s593_s17, %s594_s18  }
   0x9   :  { %586 = dma.done.wait [#allocation3], 256  }
   0xa   :  { %587 = vsyncadd [#allocation3], 4294967040 }
   0xb   :  { %588 = dma.done.wait [#allocation6], 1024  }
   0xc   :  { %589 = vsyncadd [#allocation6], 4294966272  ;;  %v480_v0 = vld [vmem:[#allocation2 + $0x8] sm:$0xff]  ;;  %v488_v1 = vld [vmem:[%s722_s3 + $0x38] sm:$0xff]  ;;  %vm88_vm0 = vcmask 261120   ;;  %s596_s12 = smov [#allocation7]  }
   0xd   :  { %98 = vmatpush.bf16.msra.mxu0 %v480_v0  ;;  %v479_v2 = vld [vmem:[#allocation2] sm:$0xff]  ;;  %175 = vmatpush.bf16.msra.mxu1 %v488_v1  ;;  %v487_v4 = vld [vmem:[%s722_s3 + $0x30] sm:$0xff]  ;;  %v486_v6 = vld [vmem:[%s722_s3 + $0x28] sm:$0xff]  ;;  %s361_s13 = sshll.u32 %s596_s12, 4  ;;  %vm354_vm1 = vcmask 130048   ;;  %s362_s13 = int_to_ptr.vmem [resolvable:$true] %s361_s13 }
   0xe   :  { %v66_v3 = vld [vmem:[%s719_s0] sm:$0xff]  ;;  %v484_v8 = vld [vmem:[%s722_s3 + $0x18] sm:$0xff]  ;;  %v483_v9 = vld [vmem:[%s722_s3 + $0x10] sm:$0xff] }
   0xf   :  { %v67_v5 = vpack.c.bf16 %v66_v3, %v66_v3  ;;  %v485_v7 = vld [vmem:[%s722_s3 + $0x20] sm:$0xff]  ;;  %v482_v10 = vld [vmem:[%s722_s3 + $0x8] sm:$0xff]  ;;  %v494_v14 = vld [vmem:[#allocation5 + $0x28] sm:$0xff] }
  0x10   :  { %v481_v11 = vld [vmem:[%s722_s3] sm:$0xff]  ;;  %v496_v12 = vld [vmem:[#allocation5 + $0x38] sm:$0xff]  ;;  %v493_v15 = vld [vmem:[#allocation5 + $0x20] sm:$0xff] }
  0x11   :  { %99 = vmatpush.bf16.msra.mxu0 %v479_v2  ;;  %176 = vmatpush.bf16.msra.mxu1 %v487_v4  ;;  %v495_v13 = vld [vmem:[#allocation5 + $0x30] sm:$0xff]  ;;  %v492_v16 = vld [vmem:[#allocation5 + $0x18] sm:$0xff]  ;;  %v490_v24 = vld [vmem:[#allocation5 + $0x8] sm:$0xff] }
  0x12   :  { %258 = vmatpush.bf16.msra.mxu2 %v496_v12  ;;  %v491_v17 = vld [vmem:[#allocation5 + $0x10] sm:$0xff]  ;;  %v489_v25 = vld [vmem:[#allocation5] sm:$0xff]  ;;  %v504_v26 = vld [vmem:[%s726_s7 + $0x38] sm:$0xff] }
  0x13   :  { %v510_v18 = vld [vmem:[%s721_s2] ss:$0 sm:$0xff]  ;;  %341 = vmatpush.bf16.msra.mxu3 %v504_v26  ;;  %v503_v27 = vld [vmem:[%s726_s7 + $0x30] sm:$0xff]  ;;  %v502_v28 = vld [vmem:[%s726_s7 + $0x28] sm:$0xff] }
  0x14   :  { %382 = vmatmul.msk.bf16.vlgmr.msra.gmra.mxu0 %vm88_vm0, %v67_v5  ;;  %v501_v29 = vld [vmem:[%s726_s7 + $0x20] sm:$0xff]  ;;  %v500_v30 = vld [vmem:[%s726_s7 + $0x18] sm:$0xff]  ;;  %v499_v31 = vld [vmem:[%s726_s7 + $0x10] sm:$0xff] }
  0x15   :  { %177 = vmatpush.bf16.msra.mxu1 %v486_v6  ;;  %v511_v32 = vld [vmem:[%s723_s4] ss:$0 sm:$0xff]  ;;  %v498_v38 = vld [vmem:[%s726_s7 + $0x8] sm:$0xff] }
  0x16   :  { %259 = vmatpush.bf16.msra.mxu2 %v495_v13  ;;  %v497_v39 = vld [vmem:[%s726_s7] sm:$0xff]  ;;  %s363_s7 = sshll.u32 %s728_s9, 4  ;;  %s364_s7 = int_to_ptr.hbm [resolvable:$true] %s363_s7 }
  0x17   :  { %342 = vmatpush.bf16.msra.mxu3 %v503_v27  ;;  %v512_v40 = vld [vmem:[%s725_s6] ss:$0 sm:$0xff] }
  0x18   :  { %v513_v46 = vld [vmem:[%s727_s8] ss:$0 sm:$0xff] }
  0x19   :  { %178 = vmatpush.bf16.msra.mxu1 %v485_v7 }
  0x1a   :  { %260 = vmatpush.bf16.msra.mxu2 %v494_v14 }
  0x1b   :  { %343 = vmatpush.bf16.msra.mxu3 %v502_v28 }
  0x1d   :  { %179 = vmatpush.bf16.msra.mxu1 %v484_v8 }
  0x1e   :  { %261 = vmatpush.bf16.msra.mxu2 %v493_v15 }
  0x1f   :  { %344 = vmatpush.bf16.msra.mxu3 %v501_v29 }
  0x21   :  { %180 = vmatpush.bf16.msra.mxu1 %v483_v9 }
  0x22   :  { %262 = vmatpush.bf16.msra.mxu2 %v492_v16 }
  0x23   :  { %345 = vmatpush.bf16.msra.mxu3 %v500_v30 }
  0x25   :  { %181 = vmatpush.bf16.msra.mxu1 %v482_v10 }
  0x26   :  { %263 = vmatpush.bf16.msra.mxu2 %v491_v17 }
  0x27   :  { %346 = vmatpush.bf16.msra.mxu3 %v499_v31 }
  0x29   :  { %182 = vmatpush.bf16.msra.mxu1 %v481_v11 }
  0x2a   :  { %264 = vmatpush.bf16.msra.mxu2 %v490_v24 }
  0x2b   :  { %347 = vmatpush.bf16.msra.mxu3 %v498_v38 }
  0x2e   :  { %265 = vmatpush.bf16.msra.mxu2 %v489_v25 }
  0x2f   :  { %348 = vmatpush.bf16.msra.mxu3 %v497_v39 }
  0x91   :  { %v101_v19 = vpop.f32.mrf.mxu0 }
  0x92   :  { %v102_v20 = vadd.f32 %v510_v18, %v101_v19 }
  0x94   :  { %v105_v21 = vmax.f32 %v102_v20, 0.0 }
  0x96   :  { %v106_v22 = vpack.c.bf16 %v105_v21, %v105_v21 }
  0x98   :  { %183 = vmatmul.bf16.vlgmr.msra.gmra.mxu1 %v106_v22 }
  0x99   :  { %v103_v23 = vpop.f32.mrf.mxu0 }
 0x115   :  { %v184_v33 = vpop.f32.mrf.mxu1 }
 0x116   :  { %v185_v34 = vadd.f32 %v511_v32, %v184_v33 }
 0x118   :  { %v188_v35 = vmax.f32 %v185_v34, 0.0 }
 0x11a   :  { %v189_v36 = vpack.c.bf16 %v188_v35, %v188_v35 }
 0x11c   :  { %266 = vmatmul.bf16.vlgmr.msra.gmra.mxu2 %v189_v36 }
 0x11d   :  { %v186_v37 = vpop.f32.mrf.mxu1 }
 0x19f   :  { %v267_v41 = vpop.f32.mrf.mxu2 }
 0x1a0   :  { %v268_v42 = vadd.f32 %v512_v40, %v267_v41 }
 0x1a2   :  { %v271_v43 = vmax.f32 %v268_v42, 0.0 }
 0x1a4   :  { %v272_v44 = vpack.c.bf16 %v271_v43, %v271_v43 }
 0x1a6   :  { %349 = vmatmul.bf16.vlgmr.msra.gmra.mxu3 %v272_v44 }
 0x1a7   :  { %v269_v45 = vpop.f32.mrf.mxu2 }
 0x229   :  { %v350_v47 = vpop.f32.mrf.mxu3 }
 0x22a   :  { %v351_v48 = vadd.f32 %v513_v46, %v350_v47 }
 0x22c   :  { %355 = vst.msk [vmem:[#allocation7] sm:$0xff] %vm354_vm1, %v351_v48 }
 0x22d   :  { %366 = dma.vmem_to_hbm [thread:$0]  %s362_s13, 128, %s364_s7, [#allocation4]  }
 0x231   :  { %v352_v49 = vpop.f32.mrf.mxu3 }
 0x232   :  { %590 = dma.done.wait [#allocation4], 128  }
 0x233   :  { %591 = vsyncadd [#allocation4], 4294967168 }
 0x234   :  { %371 = vsyncpa [#allocation3], 1 }
 0x235   :  { %372 = vsyncpa [#allocation6], 1 }
 0x236   :  { %373 = vsyncpa [#allocation4], 1 }

</bundles_post_ra>
